<compile_context>
chip_gen: v5e
topology: v5e:2x2
jax: 0.10.0
libtpu: 0.0.40
codegen_flags: <defaults>
</compile_context>

<pallas_src>
import functools

import jax
import jax.numpy as jnp
from jax.experimental import pallas as pl
from jax.experimental.pallas import tpu as pltpu


# ----------------------------------------------------------------------------- helpers
def _divisors(n):
    ds = set()
    i = 1
    while i * i <= n:
        if n % i == 0:
            ds.add(i)
            ds.add(n // i)
        i += 1
    return ds


def _vmem_capacity_bytes():
    """Per-TensorCore VMEM capacity; conservative fallback if the query is unavailable."""
    try:
        cap = int(getattr(pltpu.get_tpu_info(), "vmem_capacity_bytes", 0))
        if cap > 0:
            return cap
    except Exception:
        pass
    return 64 * 1024 * 1024  # v7x per-TC VMEM (smallest of current generations)


def _select_tiles(M, D, H, x_bytes, out_bytes, cd_bytes, vmem_budget):
    """Pick (TM, TH) under a VMEM byte budget.

    Preference order:
      1. weights fully resident (TH == H -> DMA'd once for the whole kernel) with a
         reasonable row tile,
      2. otherwise the largest feasible row tile (weight HBM traffic scales with num_m),
         then the largest hidden tile.
    """
    def usage(TM, TH, num_h):
        w = 4 * D * TH * cd_bytes                   # W1 + W2, double-buffered
        io = 2 * TM * D * (x_bytes + out_bytes)     # x / out tiles, double-buffered
        acc = TM * D * 4 if num_h > 1 else 0        # f32 accumulator scratch
        tmp = TM * TH * (4 + cd_bytes)              # f32 dot1 result + gelu temp
        bias = 2 * (TH * cd_bytes + D * 4)
        return w + io + acc + tmp + bias

    # Hidden-tile candidates: full H first (weight residency), then lane-aligned divisors.
    th_cands = [H] + sorted(
        (d for d in _divisors(H) if d != H and d % 128 == 0), reverse=True)

    # Row-tile candidates: multiples of 8 up to min(M, 1024); TM > 1024 has no extra
    # arithmetic-intensity value and capping keeps num_m >= 2 for megacore on long seqs.
    tm_cap = 1024 if M > 1024 else M
    base = (1024, 896, 768, 640, 512, 384, 256, 192, 128, 96, 64, 48, 32, 24, 16, 8)
    tm_cands = [t for t in base if t <= tm_cap]
    if tm_cap not in tm_cands:
        tm_cands = [tm_cap] + tm_cands  # tm_cap == M: full-extent block is always legal

    min_resident_tm = min(256, tm_cap)
    best = None
    for TH in th_cands:
        num_h = H // TH
        for TM in tm_cands:                      # descending: first feasible is largest
            if usage(TM, TH, num_h) <= vmem_budget:
                resident_ok = (num_h == 1) and (TM >= min_resident_tm)
                score = (resident_ok, TM, TH)
                if best is None or score > best:
                    best = score
                break
    if best is None:                             # pathological: tiny budget
        return (M if M <= 8 else 8), min(th_cands)
    return best[1], best[2]


# ----------------------------------------------------------------------------- kernels
def _ff_kernel_resident(x_ref, w1_ref, b1_ref, w2_ref, b2_ref, o_ref, *, compute_dtype):
    """Grid point m: one row tile; full hidden width resident in VMEM (single h step).

    Weights' block indices are grid-invariant, so W1/W2/b1 are DMA'd only once.
    No accumulator scratch, no init/finalize predication.
    """
    x = x_ref[...].astype(compute_dtype)
    h = jnp.dot(x, w1_ref[...], preferred_element_type=jnp.float32)       # (TM, H) f32 acc
    h = h.astype(compute_dtype) + b1_ref[...]                              # elementwise in compute dtype
    h = jax.nn.gelu(h, approximate=True)                                   # tanh GELU (matches GELU_)
    y = jnp.dot(h.astype(compute_dtype), w2_ref[...],
                preferred_element_type=jnp.float32)                        # (TM, D) f32
    o_ref[...] = (y + b2_ref[...]).astype(o_ref.dtype)


def _ff_kernel_stream(x_ref, w1_ref, b1_ref, w2_ref, b2_ref, o_ref, acc_ref, *, compute_dtype):
    """Grid point (m, h): row tile m, hidden tile h; accumulate dot2 over h in f32 scratch."""
    h_idx = pl.program_id(1)

    @pl.when(h_idx == 0)
    def _init():
        acc_ref[...] = jnp.zeros_like(acc_ref)

    x = x_ref[...].astype(compute_dtype)
    h = jnp.dot(x, w1_ref[...], preferred_element_type=jnp.float32)       # (TM, TH)
    h = h.astype(compute_dtype) + b1_ref[...]
    h = jax.nn.gelu(h, approximate=True)
    acc_ref[...] += jnp.dot(h.astype(compute_dtype), w2_ref[...],
                            preferred_element_type=jnp.float32)            # (TM, D)

    @pl.when(h_idx == pl.num_programs(1) - 1)
    def _finalize():
        o_ref[...] = (acc_ref[...] + b2_ref[...]).astype(o_ref.dtype)


# ----------------------------------------------------------------------------- wrapper
def chunk_feedforward(x, w1, b1, w2, b2, *, chunks, compute_dtype=jnp.bfloat16,
                      out_dtype=None):
    """Chunk(chunks, FeedForward, along_dim=1) forward.

    x: (B, S, D); w1: (D, H), b1: (H,), w2: (H, D), b2: (D,).
    `chunks` only controls how torch splits the work; fn is per-token so the result is
    identical regardless — kept for API parity.
    compute_dtype: MXU/elementwise dtype (bf16 default; float32 for strict parity).
    out_dtype: output dtype (defaults to x.dtype; pass bf16 to halve writeback traffic).
    """
    B, S, D = x.shape
    H = w1.shape[1]
    assert S % chunks == 0, "seq length must be divisible by chunks"
    compute_dtype = jnp.dtype(compute_dtype)
    out_dtype = jnp.dtype(out_dtype) if out_dtype is not None else x.dtype

    M = B * S
    x2 = x.reshape(M, D)                     # metadata-only reshape; x stays in its HBM dtype
    x_bytes = x2.dtype.itemsize
    out_bytes = out_dtype.itemsize
    cd_bytes = compute_dtype.itemsize

    # --- VMEM-aware tile selection ------------------------------------------------
    vmem_cap = _vmem_capacity_bytes()
    vmem_budget = int(vmem_cap * 0.75)       # what the tile search may plan to use
    vmem_limit = int(vmem_cap * 0.85)        # hard scoped limit handed to Mosaic

    TM, TH = _select_tiles(M, D, H, x_bytes, out_bytes, cd_bytes, vmem_budget)
    num_m = pl.cdiv(M, TM)
    num_h = H // TH
    Mp = num_m * TM
    if Mp != M:                              # pad rows only when TM doesn't divide M
        x2 = jnp.pad(x2, ((0, Mp - M), (0, 0)))

    # --- parameter prep: MXU operands / bias-add in compute_dtype, b2 stays f32 ----
    w1c = w1.astype(compute_dtype)
    w2c = w2.astype(compute_dtype)
    b1_2d = b1.reshape(1, H).astype(compute_dtype)
    b2_2d = b2.reshape(1, D).astype(jnp.float32)

    # --- advisory cost (accounts for weight re-reads when streaming) ---------------
    weight_reads = 1 if num_h == 1 else num_m
    cost = pl.CostEstimate(
        flops=4 * Mp * D * H,
        transcendentals=Mp * H,
        bytes_accessed=(Mp * D * (x_bytes + out_bytes)
                        + weight_reads * 2 * D * H * cd_bytes
                        + H * cd_bytes + D * 4),
    )

    if num_h == 1:
        kernel = functools.partial(_ff_kernel_resident, compute_dtype=compute_dtype)
        grid = (num_m,)
        in_specs = [
            pl.BlockSpec((TM, D), lambda m: (m, 0)),   # x row tile
            pl.BlockSpec((D, H), lambda m: (0, 0)),    # W1 (grid-invariant -> DMA'd once)
            pl.BlockSpec((1, H), lambda m: (0, 0)),    # b1
            pl.BlockSpec((H, D), lambda m: (0, 0)),    # W2 (grid-invariant -> DMA'd once)
            pl.BlockSpec((1, D), lambda m: (0, 0)),    # b2
        ]
        out_specs = pl.BlockSpec((TM, D), lambda m: (m, 0))
        scratch_shapes = []
        dim_sem = ("parallel",)
    else:
        kernel = functools.partial(_ff_kernel_stream, compute_dtype=compute_dtype)
        grid = (num_m, num_h)                          # reduction axis innermost
        in_specs = [
            pl.BlockSpec((TM, D), lambda m, h: (m, 0)),   # x row tile (reused across h)
            pl.BlockSpec((D, TH), lambda m, h: (0, h)),   # W1 hidden tile
            pl.BlockSpec((1, TH), lambda m, h: (0, h)),   # b1 hidden tile
            pl.BlockSpec((TH, D), lambda m, h: (h, 0)),   # W2 hidden tile
            pl.BlockSpec((1, D), lambda m, h: (0, 0)),    # b2
        ]
        out_specs = pl.BlockSpec((TM, D), lambda m, h: (m, 0))
        scratch_shapes = [pltpu.VMEM((TM, D), jnp.float32)]   # f32 accumulator
        dim_sem = ("parallel", "arbitrary")

    out2 = pl.pallas_call(
        kernel,
        out_shape=jax.ShapeDtypeStruct((Mp, D), out_dtype),
        grid_spec=pltpu.PrefetchScalarGridSpec(
            num_scalar_prefetch=0,
            grid=grid,
            in_specs=in_specs,
            out_specs=out_specs,
            scratch_shapes=scratch_shapes,
        ),
        compiler_params=pltpu.CompilerParams(
            dimension_semantics=dim_sem,
            vmem_limit_bytes=vmem_limit,
        ),
        cost_estimate=cost,
    )(x2, w1c, b1_2d, w2c, b2_2d)

    if Mp != M:
        out2 = out2[:M]
    return out2.reshape(B, S, D)


# ----------------------------------------------------------------------------- reference
def _reference(x, w1, b1, w2, b2, *, chunks):
    """Pure-JAX reference mirroring the PyTorch Chunk semantics literally."""
    pieces = jnp.split(x, chunks, axis=1)
    outs = []
    for c in pieces:
        h = jax.nn.gelu(c @ w1 + b1, approximate=True)
        outs.append(h @ w2 + b2)
    return jnp.concatenate(outs, axis=1)


if __name__ == "__main__":
    # Small, TPU-tile-friendly shapes: tokens flatten to (B*S, D) = (32, 128).
    B, S, D = 2, 16, 128
    mult = 2
    H = D * mult
    CHUNKS = 2

    key = jax.random.PRNGKey(0)
    kx, k1, k2, k3, k4 = jax.random.split(key, 5)

    x = jax.random.normal(kx, (B, S, D), dtype=jnp.float32)
    # Deterministic synthetic parameters (no checkpoint load).
    w1 = jax.random.normal(k1, (D, H), dtype=jnp.float32) * 0.02
    b1 = jax.random.normal(k2, (H,), dtype=jnp.float32) * 0.02
    w2 = jax.random.normal(k3, (H, D), dtype=jnp.float32) * 0.02
    b2 = jax.random.normal(k4, (D,), dtype=jnp.float32) * 0.02

    ref = _reference(x, w1, b1, w2, b2, chunks=CHUNKS)

    # Strict-parity path: f32 matmuls + f32 elementwise, tight tolerance.
    # TODO(synk): PyTorch nn.GELU defaults to the exact erf form; sinkhorn_transformer's
    # GELU_ fallback uses the tanh approximation, which is what we implement here.
    out_f32 = chunk_feedforward(x, w1, b1, w2, b2, chunks=CHUNKS,
                                compute_dtype=jnp.float32)
    out_f32 = jax.block_until_ready(out_f32)
    assert out_f32.shape == (B, S, D)
    assert jnp.allclose(out_f32, ref, atol=1e-4, rtol=1e-4), "f32 path mismatch vs reference"

    # Default fast path: bf16 MXU operands / bf16 elementwise with f32 accumulation.
    out_bf16 = chunk_feedforward(x, w1, b1, w2, b2, chunks=CHUNKS)
    out_bf16 = jax.block_until_ready(out_bf16)
    assert out_bf16.shape == (B, S, D)
    assert jnp.allclose(out_bf16, ref, atol=2e-2, rtol=2e-2), "bf16 path mismatch vs reference"

    print("KERNEL_OK")
</pallas_src>

<mosaic_0001>
module attributes {stable_mosaic.version = 11 : i64} {
  func.func @_ff_kernel_resident(%arg0: i32, %arg1: memref<32x128xf32, #tpu.memory_space<vmem>>, %arg2: memref<128x256xf32, #tpu.memory_space<vmem>>, %arg3: memref<1x256xf32, #tpu.memory_space<vmem>>, %arg4: memref<256x128xf32, #tpu.memory_space<vmem>>, %arg5: memref<1x128xf32, #tpu.memory_space<vmem>>, %arg6: memref<32x128xf32, #tpu.memory_space<vmem>>) attributes {dimension_semantics = [#tpu.dimension_semantics<parallel>], iteration_bounds = array<i64: 1>, scalar_prefetch = 0 : i64, scratch_operands = 0 : i64, tpu.core_type = #tpu.core_type<tc>, window_params = [{transform_indices = @transform_0, window_bounds = array<i64: 32, 128>}, {pipeline_mode = #tpu.pipeline_mode<synchronous>, transform_indices = @transform_1, window_bounds = array<i64: 128, 256>}, {pipeline_mode = #tpu.pipeline_mode<synchronous>, transform_indices = @transform_2, window_bounds = array<i64: 1, 256>}, {pipeline_mode = #tpu.pipeline_mode<synchronous>, transform_indices = @transform_3, window_bounds = array<i64: 256, 128>}, {pipeline_mode = #tpu.pipeline_mode<synchronous>, transform_indices = @transform_4, window_bounds = array<i64: 1, 128>}, {transform_indices = @transform_5, window_bounds = array<i64: 32, 128>}]} {
    %c0 = arith.constant 0 : index
    %c0_0 = arith.constant 0 : index
    %0 = vector.load %arg1[%c0, %c0_0] : memref<32x128xf32, #tpu.memory_space<vmem>>, vector<32x128xf32>
    %c0_1 = arith.constant 0 : index
    %c0_2 = arith.constant 0 : index
    %1 = vector.load %arg2[%c0_1, %c0_2] : memref<128x256xf32, #tpu.memory_space<vmem>>, vector<128x256xf32>
    %cst = arith.constant dense<0.000000e+00> : vector<32x256xf32>
    %2 = tpu.matmul %0, %1, %cst {dimension_numbers = #tpu.dot_dimension_numbers<[1], [0], [0], [1], [0, 0, 1, 1], [], []>} : vector<32x128xf32>, vector<128x256xf32>, vector<32x256xf32> -> vector<32x256xf32>
    %c0_3 = arith.constant 0 : index
    %c0_4 = arith.constant 0 : index
    %3 = vector.load %arg3[%c0_3, %c0_4] : memref<1x256xf32, #tpu.memory_space<vmem>>, vector<1x256xf32>
    %4 = vector.broadcast %3 : vector<1x256xf32> to vector<32x256xf32>
    %5 = arith.addf %2, %4 : vector<32x256xf32>
    %6 = arith.mulf %5, %5 : vector<32x256xf32>
    %7 = arith.mulf %5, %6 : vector<32x256xf32>
    %cst_5 = arith.constant 4.471500e-02 : f32
    %8 = vector.broadcast %cst_5 : f32 to vector<32x256xf32>
    %9 = arith.mulf %8, %7 : vector<32x256xf32>
    %10 = arith.addf %5, %9 : vector<32x256xf32>
    %cst_6 = arith.constant 0.797884583 : f32
    %11 = vector.broadcast %cst_6 : f32 to vector<32x256xf32>
    %12 = arith.mulf %11, %10 : vector<32x256xf32>
    %13 = math.tanh %12 : vector<32x256xf32>
    %cst_7 = arith.constant 1.000000e+00 : f32
    %14 = vector.broadcast %cst_7 : f32 to vector<32x256xf32>
    %15 = arith.addf %14, %13 : vector<32x256xf32>
    %cst_8 = arith.constant 5.000000e-01 : f32
    %16 = vector.broadcast %cst_8 : f32 to vector<32x256xf32>
    %17 = arith.mulf %16, %15 : vector<32x256xf32>
    %18 = arith.mulf %5, %17 : vector<32x256xf32>
    %c0_9 = arith.constant 0 : index
    %c0_10 = arith.constant 0 : index
    %19 = vector.load %arg4[%c0_9, %c0_10] : memref<256x128xf32, #tpu.memory_space<vmem>>, vector<256x128xf32>
    %cst_11 = arith.constant dense<0.000000e+00> : vector<32x128xf32>
    %20 = tpu.matmul %18, %19, %cst_11 {dimension_numbers = #tpu.dot_dimension_numbers<[1], [0], [0], [1], [0, 0, 1, 1], [], []>} : vector<32x256xf32>, vector<256x128xf32>, vector<32x128xf32> -> vector<32x128xf32>
    %c0_12 = arith.constant 0 : index
    %c0_13 = arith.constant 0 : index
    %21 = vector.load %arg5[%c0_12, %c0_13] : memref<1x128xf32, #tpu.memory_space<vmem>>, vector<1x128xf32>
    %22 = vector.broadcast %21 : vector<1x128xf32> to vector<32x128xf32>
    %23 = arith.addf %20, %22 : vector<32x128xf32>
    %c0_14 = arith.constant 0 : index
    %c0_15 = arith.constant 0 : index
    %24 = vector.load %arg6[%c0_14, %c0_15] : memref<32x128xf32, #tpu.memory_space<vmem>>, vector<32x128xf32>
    tpu.vector_store %arg6[%c0_14, %c0_15], %23 {strides = array<i32>} : memref<32x128xf32, #tpu.memory_space<vmem>>, vector<32x128xf32>,
    return
  }
  func.func @transform_0(%arg0: i32) -> (i32, i32) {
    %c0_i32 = arith.constant 0 : i32
    %c0_i32_0 = arith.constant 0 : i32
    return %arg0, %c0_i32 : i32, i32
  }
  func.func @transform_1(%arg0: i32) -> (i32, i32) {
    %c0_i32 = arith.constant 0 : i32
    %c0_i32_0 = arith.constant 0 : i32
    %c0_i32_1 = arith.constant 0 : i32
    return %c0_i32, %c0_i32_0 : i32, i32
  }
  func.func @transform_2(%arg0: i32) -> (i32, i32) {
    %c0_i32 = arith.constant 0 : i32
    %c0_i32_0 = arith.constant 0 : i32
    %c0_i32_1 = arith.constant 0 : i32
    return %c0_i32, %c0_i32_0 : i32, i32
  }
  func.func @transform_3(%arg0: i32) -> (i32, i32) {
    %c0_i32 = arith.constant 0 : i32
    %c0_i32_0 = arith.constant 0 : i32
    %c0_i32_1 = arith.constant 0 : i32
    return %c0_i32, %c0_i32_0 : i32, i32
  }
  func.func @transform_4(%arg0: i32) -> (i32, i32) {
    %c0_i32 = arith.constant 0 : i32
    %c0_i32_0 = arith.constant 0 : i32
    %c0_i32_1 = arith.constant 0 : i32
    return %c0_i32, %c0_i32_0 : i32, i32
  }
  func.func @transform_5(%arg0: i32) -> (i32, i32) {
    %c0_i32 = arith.constant 0 : i32
    %c0_i32_0 = arith.constant 0 : i32
    return %arg0, %c0_i32 : i32, i32
  }
}

</mosaic_0001>

<bundles_post_ra>
// kernel: tpu_custom_call.1
= control target key start
LH: loop header
LB: loop body
LE: loop exit
PB: predicated region body
PF: predicated region fallthrough
CT: control target
= control target key end

     0   :  { %10 = vsyncpa [#allocation3], 0  ;;  %s593_s0 = inlined_call_operand.hbm [shape: f32[32,128], index: 0, kind: input, shape index: {}]   ;;  %s594_s1 = inlined_call_operand.hbm [shape: f32[128,256], index: 1, kind: input, shape index: {}]   ;;  %s595_s2 = inlined_call_operand.hbm [shape: f32[1,256], index: 2, kind: input, shape index: {}]   ;;  %s596_s3 = inlined_call_operand.hbm [shape: f32[256,128], index: 3, kind: input, shape index: {}]   ;;  %s597_s4 = inlined_call_operand.vmem [shape: f32[1,128], index: 4, kind: input, shape index: {}]   ;;  %s598_s5 = inlined_call_operand.hbm [shape: f32[32,128], index: 5, kind: output, shape index: {}]  }
   0x1   :  { %11 = vsyncpa [#allocation6], 0 }
   0x2   :  { %12 = vsyncpa [#allocation9], 0  ;;  %s31_s20 = sshll.u32 %s594_s1, 4  ;;  %s32_s20 = int_to_ptr.hbm [resolvable:$true] %s31_s20 }
   0x3   :  { %13 = vsyncpa [#allocation4], 0  ;;  %s527_s21 = smov [#allocation5]   ;;  %s18_s25 = sshll.u32 %s593_s0, 4  ;;  %s19_s25 = int_to_ptr.hbm [resolvable:$true] %s18_s25 }
   0x4   :  { %s33_s22 = sshll.u32 %s527_s21, 4  ;;  %s528_s26 = smov 256   ;;  %s34_s22 = int_to_ptr.vmem [resolvable:$true] %s33_s22 }
   0x5   :  { %s529_s27 = smov 16   ;;  %s530_s28 = smov [#allocation2]  }
   0x6   :  { %39 = dma.hbm_to_vmem [thread:$0]  %s32_s20, 4096, %s34_s22, [#allocation6], %s528_s26, %s528_s26, %s529_s27  }
   0x7   :  { %s20_s29 = sshll.u32 %s530_s28, 4  ;;  %s531_s30 = smov 128   ;;  %s21_s29 = int_to_ptr.vmem [resolvable:$true] %s20_s29 }
   0x8   :  { %s532_s6 = smov 8   ;;  %s45_s8 = sshll.u32 %s595_s2, 4  ;;  %s46_s8 = int_to_ptr.hbm [resolvable:$true] %s45_s8 }
   0x9   :  { %26 = dma.hbm_to_vmem [thread:$0]  %s19_s25, 512, %s21_s29, [#allocation3], %s531_s30, %s531_s30, %s532_s6  }
   0xa   :  { %s533_s9 = smov [#allocation7]   ;;  %s55_s12 = sshll.u32 %s596_s3, 4  ;;  %s56_s12 = int_to_ptr.hbm [resolvable:$true] %s55_s12 }
   0xb   :  { %s47_s0 = sshll.u32 %s533_s9, 4  ;;  %s534_s13 = smov [#allocation8]   ;;  %s48_s0 = int_to_ptr.vmem [resolvable:$true] %s47_s0 }
   0xc   :  { %50 = dma.hbm_to_vmem [thread:$0]  %s46_s8, 32, %s48_s0, [#allocation6]  }
   0xd   :  { %s57_s14 = sshll.u32 %s534_s13, 4  ;;  %s58_s14 = int_to_ptr.vmem [resolvable:$true] %s57_s14 }
   0xe   :  { %63 = dma.hbm_to_vmem [thread:$0]  %s56_s12, 4096, %s58_s14, [#allocation9], %s531_s30, %s531_s30, %s532_s6  }
   0xf   :  { %519 = dma.done.wait [#allocation3], 512  }
  0x10   :  { %520 = vsyncadd [#allocation3], 4294966784 }
  0x11   :  { %521 = dma.done.wait [#allocation6], 4128  }
  0x12   :  { %522 = vsyncadd [#allocation6], 4294963168 }
  0x13   :  { %523 = dma.done.wait [#allocation9], 4096  }
  0x14   :  { %524 = vsyncadd [#allocation9], 4294963200  ;;  %v116_v0 = vld [vmem:[#allocation5 + $0xf0] sm:$0xff]  ;;  %v117_v1 = vld [vmem:[#allocation5 + $0xf8] sm:$0xff]  ;;  %s535_s15 = smov [#allocation10]   ;;  %s358_s18 = sshll.u32 %s598_s5, 4  ;;  %s359_s18 = int_to_ptr.hbm [resolvable:$true] %s358_s18 }
  0x15   :  { %v114_v2 = vld [vmem:[#allocation5 + $0xe0] sm:$0xff]  ;;  %124 = vmatpush.msra.mxu0 %v116_v0  ;;  %153 = vmatpush.msra.mxu1 %v117_v1  ;;  %v115_v3 = vld [vmem:[#allocation5 + $0xe8] sm:$0xff]  ;;  %v112_v4 = vld [vmem:[#allocation5 + $0xd0] sm:$0xff]  ;;  %s356_s16 = sshll.u32 %s535_s15, 4  ;;  %s357_s16 = int_to_ptr.vmem [resolvable:$true] %s356_s16 }
  0x16   :  { %v113_v5 = vld [vmem:[#allocation5 + $0xd8] sm:$0xff]  ;;  %v110_v6 = vld [vmem:[#allocation5 + $0xc0] sm:$0xff]  ;;  %v111_v7 = vld [vmem:[#allocation5 + $0xc8] sm:$0xff] }
  0x17   :  { %125 = vmatpush.msra.mxu0 %v114_v2  ;;  %154 = vmatpush.msra.mxu1 %v115_v3  ;;  %v108_v8 = vld [vmem:[#allocation5 + $0xb0] sm:$0xff]  ;;  %v109_v9 = vld [vmem:[#allocation5 + $0xb8] sm:$0xff]  ;;  %v106_v10 = vld [vmem:[#allocation5 + $0xa0] sm:$0xff] }
  0x18   :  { %v107_v11 = vld [vmem:[#allocation5 + $0xa8] sm:$0xff]  ;;  %v104_v12 = vld [vmem:[#allocation5 + $0x90] sm:$0xff]  ;;  %v105_v13 = vld [vmem:[#allocation5 + $0x98] sm:$0xff] }
  0x19   :  { %126 = vmatpush.msra.mxu0 %v112_v4  ;;  %155 = vmatpush.msra.mxu1 %v113_v5  ;;  %v102_v14 = vld [vmem:[#allocation5 + $0x80] sm:$0xff]  ;;  %v103_v15 = vld [vmem:[#allocation5 + $0x88] sm:$0xff]  ;;  %v100_v16 = vld [vmem:[#allocation5 + $0x70] sm:$0xff] }
  0x1a   :  { %v101_v17 = vld [vmem:[#allocation5 + $0x78] sm:$0xff]  ;;  %v98_v18 = vld [vmem:[#allocation5 + $0x60] sm:$0xff]  ;;  %v99_v19 = vld [vmem:[#allocation5 + $0x68] sm:$0xff] }
  0x1b   :  { %127 = vmatpush.msra.mxu0 %v110_v6  ;;  %156 = vmatpush.msra.mxu1 %v111_v7  ;;  %v96_v20 = vld [vmem:[#allocation5 + $0x50] sm:$0xff]  ;;  %v97_v21 = vld [vmem:[#allocation5 + $0x58] sm:$0xff]  ;;  %v94_v22 = vld [vmem:[#allocation5 + $0x40] sm:$0xff] }
  0x1c   :  { %v95_v23 = vld [vmem:[#allocation5 + $0x48] sm:$0xff]  ;;  %v92_v24 = vld [vmem:[#allocation5 + $0x30] sm:$0xff]  ;;  %v93_v25 = vld [vmem:[#allocation5 + $0x38] sm:$0xff] }
  0x1d   :  { %128 = vmatpush.msra.mxu0 %v108_v8  ;;  %157 = vmatpush.msra.mxu1 %v109_v9  ;;  %v90_v26 = vld [vmem:[#allocation5 + $0x20] sm:$0xff]  ;;  %v91_v27 = vld [vmem:[#allocation5 + $0x28] sm:$0xff]  ;;  %v268_v30 = vld [vmem:[#allocation8 + $0x70] sm:$0xff] }
  0x1e   :  { %v269_v28 = vld [vmem:[#allocation8 + $0x78] sm:$0xff]  ;;  %v284_v31 = vld [vmem:[#allocation8 + $0xf0] sm:$0xff]  ;;  %v267_v34 = vld [vmem:[#allocation8 + $0x68] sm:$0xff] }
  0x1f   :  { %129 = vmatpush.msra.mxu0 %v106_v10  ;;  %158 = vmatpush.msra.mxu1 %v107_v11  ;;  %v285_v29 = vld [vmem:[#allocation8 + $0xf8] sm:$0xff]  ;;  %v88_v32 = vld [vmem:[#allocation5 + $0x10] sm:$0xff]  ;;  %v87_v37 = vld [vmem:[#allocation5 + $0x8] sm:$0xff] }
  0x20   :  { %v89_v33 = vld [vmem:[#allocation5 + $0x18] sm:$0xff]  ;;  %290 = vmatpush.msra.mxu2 %v269_v28  ;;  %319 = vmatpush.msra.mxu3 %v285_v29  ;;  %v283_v35 = vld [vmem:[#allocation8 + $0xe8] sm:$0xff]  ;;  %v86_v36 = vld [vmem:[#allocation5] sm:$0xff] }
  0x21   :  { %130 = vmatpush.msra.mxu0 %v104_v12  ;;  %159 = vmatpush.msra.mxu1 %v105_v13  ;;  %v82_v38 = vld [vmem:[#allocation2] sm:$0xff]  ;;  %v83_v39 = vld [vmem:[#allocation2 + $0x8] sm:$0xff]  ;;  %v84_v40 = vld [vmem:[#allocation2 + $0x10] sm:$0xff] }
  0x22   :  { %291 = vmatpush.msra.mxu2 %v268_v30  ;;  %320 = vmatpush.msra.mxu3 %v284_v31  ;;  %v85_v41 = vld [vmem:[#allocation2 + $0x18] sm:$0xff]  ;;  %v266_v42 = vld [vmem:[#allocation8 + $0x60] sm:$0xff]  ;;  %v263_v48 = vld [vmem:[#allocation8 + $0x48] sm:$0xff] }
  0x23   :  { %131 = vmatpush.msra.mxu0 %v102_v14  ;;  %160 = vmatpush.msra.mxu1 %v103_v15  ;;  %v282_v43 = vld [vmem:[#allocation8 + $0xe0] sm:$0xff]  ;;  %v265_v44 = vld [vmem:[#allocation8 + $0x58] sm:$0xff]  ;;  %v264_v46 = vld [vmem:[#allocation8 + $0x50] sm:$0xff] }
  0x24   :  { %292 = vmatpush.msra.mxu2 %v267_v34  ;;  %321 = vmatpush.msra.mxu3 %v283_v35  ;;  %v281_v45 = vld [vmem:[#allocation8 + $0xd8] sm:$0xff]  ;;  %v280_v47 = vld [vmem:[#allocation8 + $0xd0] sm:$0xff]  ;;  %v279_v49 = vld [vmem:[#allocation8 + $0xc8] sm:$0xff] }
  0x25   :  { %132 = vmatpush.msra.mxu0 %v100_v16  ;;  %161 = vmatpush.msra.mxu1 %v101_v17  ;;  %v262_v50 = vld [vmem:[#allocation8 + $0x40] sm:$0xff]  ;;  %v261_v52 = vld [vmem:[#allocation8 + $0x38] sm:$0xff]  ;;  %v260_v54 = vld [vmem:[#allocation8 + $0x30] sm:$0xff] }
  0x26   :  { %293 = vmatpush.msra.mxu2 %v266_v42  ;;  %322 = vmatpush.msra.mxu3 %v282_v43  ;;  %v278_v51 = vld [vmem:[#allocation8 + $0xc0] sm:$0xff]  ;;  %v277_v53 = vld [vmem:[#allocation8 + $0xb8] sm:$0xff]  ;;  %v276_v55 = vld [vmem:[#allocation8 + $0xb0] sm:$0xff] }
  0x27   :  { %133 = vmatpush.msra.mxu0 %v98_v18  ;;  %162 = vmatpush.msra.mxu1 %v99_v19  ;;  %v259_v56 = vld [vmem:[#allocation8 + $0x28] sm:$0xff]  ;;  %v258_v58 = vld [vmem:[#allocation8 + $0x20] sm:$0xff]  ;;  %v257_v60 = vld [vmem:[#allocation8 + $0x18] sm:$0xff] }
  0x28   :  { %294 = vmatpush.msra.mxu2 %v265_v44  ;;  %323 = vmatpush.msra.mxu3 %v281_v45  ;;  %v275_v57 = vld [vmem:[#allocation8 + $0xa8] sm:$0xff]  ;;  %v274_v59 = vld [vmem:[#allocation8 + $0xa0] sm:$0xff]  ;;  %v273_v61 = vld [vmem:[#allocation8 + $0x98] sm:$0xff] }
  0x29   :  { %134 = vmatpush.msra.mxu0 %v96_v20  ;;  %163 = vmatpush.msra.mxu1 %v97_v21  ;;  %v256_v62 = vld [vmem:[#allocation8 + $0x10] sm:$0xff]  ;;  %v255_v0 = vld [vmem:[#allocation8 + $0x8] sm:$0xff]  ;;  %v254_v2 = vld [vmem:[#allocation8] sm:$0xff] }
  0x2a   :  { %295 = vmatpush.msra.mxu2 %v264_v46  ;;  %324 = vmatpush.msra.mxu3 %v280_v47  ;;  %v272_v63 = vld [vmem:[#allocation8 + $0x90] sm:$0xff]  ;;  %v271_v1 = vld [vmem:[#allocation8 + $0x88] sm:$0xff]  ;;  %v270_v3 = vld [vmem:[#allocation8 + $0x80] sm:$0xff] }
  0x2b   :  { %135 = vmatpush.msra.mxu0 %v94_v22  ;;  %164 = vmatpush.msra.mxu1 %v95_v23  ;;  %v118_v4 = vld [vmem:[#allocation7] sm:$0x3] }
  0x2c   :  { %296 = vmatpush.msra.mxu2 %v263_v48  ;;  %325 = vmatpush.msra.mxu3 %v279_v49  ;;  %v120_v5 = vperm.slane %v118_v4, 0  ;;  %v121_v6 = vperm.slane %v118_v4, 1 }
  0x2d   :  { %136 = vmatpush.msra.mxu0 %v92_v24  ;;  %165 = vmatpush.msra.mxu1 %v93_v25 }
  0x2e   :  { %297 = vmatpush.msra.mxu2 %v262_v50  ;;  %326 = vmatpush.msra.mxu3 %v278_v51 }
  0x2f   :  { %137 = vmatpush.msra.mxu0 %v90_v26  ;;  %166 = vmatpush.msra.mxu1 %v91_v27 }
  0x30   :  { %298 = vmatpush.msra.mxu2 %v261_v52  ;;  %327 = vmatpush.msra.mxu3 %v277_v53 }
  0x31   :  { %138 = vmatpush.msra.mxu0 %v88_v32  ;;  %167 = vmatpush.msra.mxu1 %v89_v33 }
  0x32   :  { %299 = vmatpush.msra.mxu2 %v260_v54  ;;  %328 = vmatpush.msra.mxu3 %v276_v55 }
  0x33   :  { %139 = vmatpush.msra.mxu0 %v86_v36  ;;  %168 = vmatpush.msra.mxu1 %v87_v37 }
  0x34   :  { %140 = vmatmul.f32.vlgmr.msra.gmra.mxu0 %v82_v38  ;;  %169 = vmatmul.f32.vlgmr.msra.gmra.mxu1 %v82_v38 }
  0x35   :  { %300 = vmatpush.msra.mxu2 %v259_v56  ;;  %329 = vmatpush.msra.mxu3 %v275_v57 }
  0x37   :  { %301 = vmatpush.msra.mxu2 %v258_v58  ;;  %330 = vmatpush.msra.mxu3 %v274_v59 }
  0x39   :  { %302 = vmatpush.msra.mxu2 %v257_v60  ;;  %331 = vmatpush.msra.mxu3 %v273_v61 }
  0x3b   :  { %303 = vmatpush.msra.mxu2 %v256_v62  ;;  %332 = vmatpush.msra.mxu3 %v272_v63 }
  0x3c   :  { %143 = vmatmul.f32.gmra.mxu0 %v83_v39  ;;  %172 = vmatmul.f32.gmra.mxu1 %v83_v39 }
  0x3d   :  { %304 = vmatpush.msra.mxu2 %v255_v0  ;;  %333 = vmatpush.msra.mxu3 %v271_v1 }
  0x3f   :  { %305 = vmatpush.msra.mxu2 %v254_v2  ;;  %334 = vmatpush.msra.mxu3 %v270_v3 }
  0x44   :  { %146 = vmatmul.f32.gmra.mxu0 %v84_v40  ;;  %175 = vmatmul.f32.gmra.mxu1 %v84_v40 }
  0x4c   :  { %149 = vmatmul.f32.gmra.mxu0 %v85_v41  ;;  %178 = vmatmul.f32.gmra.mxu1 %v85_v41 }
  0xb1   :  { %v141_v7 = vpop.f32.mrf.mxu0  ;;  %v170_v8 = vpop.f32.mrf.mxu1 }
  0xb2   :  { %v142_v9 = vadd.f32 %v141_v7, %v120_v5  ;;  %v171_v10 = vadd.f32 %v170_v8, %v121_v6 }
  0xb4   :  { %v182_v11 = vmul.f32 %v142_v9, %v142_v9  ;;  %v183_v12 = vmul.f32 %v171_v10, %v171_v10 }
  0xb6   :  { %v190_v13 = vmul.f32 %v182_v11, %v142_v9  ;;  %v191_v14 = vmul.f32 %v183_v12, %v171_v10 }
  0xb8   :  { %v198_v15 = vmul.f32 0.044715, %v190_v13  ;;  %v199_v16 = vmul.f32 0.044715, %v191_v14 }
  0xb9   :  { %v144_v17 = vpop.f32.mrf.mxu0  ;;  %v173_v18 = vpop.f32.mrf.mxu1 }
  0xba   :  { %v145_v19 = vadd.f32 %v144_v17, %v120_v5  ;;  %v174_v20 = vadd.f32 %v173_v18, %v121_v6  ;;  %v206_v21 = vadd.f32 %v198_v15, %v142_v9  ;;  %v207_v22 = vadd.f32 %v199_v16, %v171_v10 }
  0xbc   :  { %v184_v23 = vmul.f32 %v145_v19, %v145_v19  ;;  %v185_v24 = vmul.f32 %v174_v20, %v174_v20  ;;  %v214_v25 = vmul.f32 0.7978846, %v206_v21  ;;  %v215_v26 = vmul.f32 0.7978846, %v207_v22 }
  0xbe   :  { %v192_v27 = vmul.f32 %v184_v23, %v145_v19  ;;  %v193_v28 = vmul.f32 %v185_v24, %v174_v20  ;;  %383 = vtanh.f32 %v214_v25 }
  0xbf   :  { %385 = vtanh.f32 %v215_v26 }
  0xc0   :  { %v200_v29 = vmul.f32 0.044715, %v192_v27  ;;  %v201_v30 = vmul.f32 0.044715, %v193_v28 }
  0xc1   :  { %v147_v31 = vpop.f32.mrf.mxu0  ;;  %v176_v32 = vpop.f32.mrf.mxu1 }
  0xc2   :  { %v148_v33 = vadd.f32 %v147_v31, %v120_v5  ;;  %v177_v34 = vadd.f32 %v176_v32, %v121_v6  ;;  %v208_v35 = vadd.f32 %v200_v29, %v145_v19  ;;  %v209_v36 = vadd.f32 %v201_v30, %v174_v20  ;;  %v382_v31 = vld [vmem:[%s597_s4] ss:$0 sm:$0xff] }
  0xc4   :  { %v384_v37 = vpop.eup %383  ;;  %v186_v38 = vmul.f32 %v148_v33, %v148_v33  ;;  %v187_v39 = vmul.f32 %v177_v34, %v177_v34  ;;  %v216_v40 = vmul.f32 0.7978846, %v208_v35  ;;  %v217_v41 = vmul.f32 0.7978846, %v209_v36 }
  0xc5   :  { %v386_v42 = vpop.eup %385  ;;  %v230_v43 = vadd.f32 1.0, %v384_v37 }
  0xc6   :  { %v194_v44 = vmul.f32 %v186_v38, %v148_v33  ;;  %v195_v45 = vmul.f32 %v187_v39, %v177_v34  ;;  %v231_v46 = vadd.f32 1.0, %v386_v42  ;;  %387 = vtanh.f32 %v216_v40 }
  0xc7   :  { %v238_v47 = vmul.f32 0.5, %v230_v43  ;;  %389 = vtanh.f32 %v217_v41 }
  0xc8   :  { %v239_v48 = vmul.f32 0.5, %v231_v46  ;;  %v202_v49 = vmul.f32 0.044715, %v194_v44  ;;  %v203_v50 = vmul.f32 0.044715, %v195_v45 }
  0xc9   :  { %v150_v51 = vpop.f32.mrf.mxu0  ;;  %v179_v52 = vpop.f32.mrf.mxu1  ;;  %v246_v53 = vmul.f32 %v238_v47, %v142_v9 }
  0xca   :  { %v151_v54 = vadd.f32 %v150_v51, %v120_v5  ;;  %v180_v55 = vadd.f32 %v179_v52, %v121_v6  ;;  %v247_v56 = vmul.f32 %v239_v48, %v171_v10  ;;  %v210_v57 = vadd.f32 %v202_v49, %v148_v33 }
  0xcb   :  { %306 = vmatmul.f32.vlgmr.msra.gmra.mxu2 %v246_v53  ;;  %v211_v58 = vadd.f32 %v203_v50, %v177_v34 }
  0xcc   :  { %v388_v59 = vpop.eup %387  ;;  %v188_v60 = vmul.f32 %v151_v54, %v151_v54  ;;  %v189_v61 = vmul.f32 %v180_v55, %v180_v55  ;;  %335 = vmatmul.f32.vlgmr.msra.gmra.mxu3 %v247_v56  ;;  %v218_v62 = vmul.f32 0.7978846, %v210_v57 }
  0xcd   :  { %v390_v63 = vpop.eup %389  ;;  %v232_v0 = vadd.f32 1.0, %v388_v59  ;;  %v219_v1 = vmul.f32 0.7978846, %v211_v58 }
  0xce   :  { %v196_v2 = vmul.f32 %v188_v60, %v151_v54  ;;  %v197_v3 = vmul.f32 %v189_v61, %v180_v55  ;;  %v233_v4 = vadd.f32 1.0, %v390_v63  ;;  %391 = vtanh.f32 %v218_v62 }
  0xcf   :  { %v240_v7 = vmul.f32 0.5, %v232_v0  ;;  %393 = vtanh.f32 %v219_v1 }
  0xd0   :  { %v241_v5 = vmul.f32 0.5, %v233_v4  ;;  %v204_v6 = vmul.f32 0.044715, %v196_v2  ;;  %v205_v8 = vmul.f32 0.044715, %v197_v3 }
  0xd1   :  { %v248_v9 = vmul.f32 %v240_v7, %v145_v19 }
  0xd2   :  { %v249_v10 = vmul.f32 %v241_v5, %v174_v20  ;;  %v212_v11 = vadd.f32 %v204_v6, %v151_v54  ;;  %v213_v12 = vadd.f32 %v205_v8, %v180_v55 }
  0xd3   :  { %309 = vmatmul.f32.gmra.mxu2 %v248_v9 }
  0xd4   :  { %v392_v13 = vpop.eup %391  ;;  %338 = vmatmul.f32.gmra.mxu3 %v249_v10  ;;  %v220_v14 = vmul.f32 0.7978846, %v212_v11  ;;  %v221_v15 = vmul.f32 0.7978846, %v213_v12 }
  0xd5   :  { %v394_v16 = vpop.eup %393  ;;  %v234_v17 = vadd.f32 1.0, %v392_v13 }
  0xd6   :  { %v235_v18 = vadd.f32 1.0, %v394_v16  ;;  %395 = vtanh.f32 %v220_v14 }
  0xd7   :  { %v242_v21 = vmul.f32 0.5, %v234_v17  ;;  %397 = vtanh.f32 %v221_v15 }
  0xd8   :  { %v243_v22 = vmul.f32 0.5, %v235_v18 }
  0xd9   :  { %v250_v23 = vmul.f32 %v242_v21, %v148_v33 }
  0xda   :  { %v251_v24 = vmul.f32 %v243_v22, %v177_v34 }
  0xdb   :  { %312 = vmatmul.f32.gmra.mxu2 %v250_v23 }
  0xdc   :  { %v396_v25 = vpop.eup %395  ;;  %341 = vmatmul.f32.gmra.mxu3 %v251_v24 }
  0xdd   :  { %v398_v19 = vpop.eup %397  ;;  %v236_v20 = vadd.f32 1.0, %v396_v25 }
  0xde   :  { %v237_v26 = vadd.f32 1.0, %v398_v19 }
  0xdf   :  { %v244_v27 = vmul.f32 0.5, %v236_v20 }
  0xe0   :  { %v245_v28 = vmul.f32 0.5, %v237_v26 }
  0xe1   :  { %v252_v29 = vmul.f32 %v244_v27, %v151_v54 }
  0xe2   :  { %v253_v30 = vmul.f32 %v245_v28, %v180_v55 }
  0xe3   :  { %315 = vmatmul.f32.gmra.mxu2 %v252_v29 }
  0xe4   :  { %344 = vmatmul.f32.gmra.mxu3 %v253_v30 }
 0x14e   :  { %v307_v32 = vpop.f32.mrf.mxu2 }
 0x14f   :  { %v308_v35 = vadd.f32 %v382_v31, %v307_v32  ;;  %v336_v33 = vpop.f32.mrf.mxu3 }
 0x151   :  { %v337_v34 = vadd.f32 %v336_v33, %v308_v35 }
 0x153   :  { %348 = vst [vmem:[#allocation10] sm:$0xff] %v337_v34 }
 0x156   :  { %v310_v36 = vpop.f32.mrf.mxu2 }
 0x157   :  { %v311_v37 = vadd.f32 %v382_v31, %v310_v36  ;;  %v339_v38 = vpop.f32.mrf.mxu3 }
 0x159   :  { %v340_v39 = vadd.f32 %v339_v38, %v311_v37 }
 0x15b   :  { %349 = vst [vmem:[#allocation10 + $0x8] sm:$0xff] %v340_v39 }
 0x15e   :  { %v313_v40 = vpop.f32.mrf.mxu2 }
 0x15f   :  { %v314_v41 = vadd.f32 %v382_v31, %v313_v40  ;;  %v342_v42 = vpop.f32.mrf.mxu3 }
 0x161   :  { %v343_v43 = vadd.f32 %v342_v42, %v314_v41 }
 0x163   :  { %350 = vst [vmem:[#allocation10 + $0x10] sm:$0xff] %v343_v43 }
 0x166   :  { %v316_v44 = vpop.f32.mrf.mxu2 }
 0x167   :  { %v317_v45 = vadd.f32 %v382_v31, %v316_v44  ;;  %v345_v46 = vpop.f32.mrf.mxu3 }
 0x169   :  { %v346_v47 = vadd.f32 %v345_v46, %v317_v45 }
 0x16b   :  { %351 = vst [vmem:[#allocation10 + $0x18] sm:$0xff] %v346_v47 }
 0x16c   :  { %364 = dma.vmem_to_hbm [thread:$0]  %s357_s16, 512, %s359_s18, [#allocation4], %s531_s30, %s531_s30, %s532_s6  }
 0x16d   :  { %525 = dma.done.wait [#allocation4], 512  }
 0x16e   :  { %526 = vsyncadd [#allocation4], 4294966784 }
 0x16f   :  { %369 = vsyncpa [#allocation3], 1 }
 0x170   :  { %370 = vsyncpa [#allocation6], 1 }
 0x171   :  { %371 = vsyncpa [#allocation9], 1 }
 0x172   :  { %372 = vsyncpa [#allocation4], 1 }

</bundles_post_ra>
